<compile_context>
chip_gen: v7x
topology: tpu7x:2x2x1
jax: 0.10.0
libtpu: 0.0.40
codegen_flags: <defaults>
</compile_context>

<pallas_src>
import functools

import jax
import jax.numpy as jnp
from jax.experimental import pallas as pl
from jax.experimental.pallas import tpu as pltpu

_LANE_ALIGN = 256  # multiple of the v6e/v7x MXU width (and of v5e's 128)


def _round_up(x: int, m: int) -> int:
    return (x + m - 1) // m * m


def _softplus(x):
    # numerically stable log(1 + exp(x)); matches torch.nn.functional.softplus
    return jnp.maximum(x, 0.0) + jnp.log1p(jnp.exp(-jnp.abs(x)))


def _use_bf16_activations() -> bool:
    # v6e / v7x EUPs have a bf16 path (~2x tanh/exp throughput); v5e and older do not,
    # so there a bf16 activation path would only add pack/unpack VALU work.
    try:
        kind = jax.devices()[0].device_kind.lower()
    except Exception:
        return False
    return not any(tag in kind for tag in ("v2", "v3", "v4", "v5"))


def _make_kernel(act_dtype):
    def kernel(xt_ref, w1_ref, b1_ref, w2_ref, b2_ref, w3_ref, b3_ref, o_ref):
        # Batch rides the lane axis: every activation is (features, TILE_B).
        xt = xt_ref[...]                                                    # (F_in, TILE_B) bf16
        # ---- layer 1: (H, F_in) @ (F_in, TILE_B) on the MXU, f32 accumulate ----
        h1 = jnp.dot(w1_ref[...], xt, preferred_element_type=jnp.float32) + b1_ref[...]
        h1 = jnp.tanh(h1.astype(act_dtype)).astype(jnp.bfloat16)           # EUP (bf16 on v6e/v7x)
        # ---- layer 2: (H, H) @ (H, TILE_B) ----
        h2 = jnp.dot(w2_ref[...], h1, preferred_element_type=jnp.float32) + b2_ref[...]
        h2 = jnp.tanh(h2.astype(act_dtype)).astype(jnp.bfloat16)
        # ---- layer 3 (out_dim == 1): (1, H) @ (H, TILE_B) -> already lane-dense ----
        z = jnp.dot(w3_ref[...], h2, preferred_element_type=jnp.float32) + b3_ref[0]
        o_ref[...] = _softplus(z).astype(o_ref.dtype)                      # softplus kept in f32

    return kernel


def prepare_params(w1, b1, w2, b2, w3, b3):
    """One-time prep (hoisted out of the hot path).

    Math-layout params (w: (in, out), b: (1, out)) -> kernel layout:
      weights (out, in) in bf16 for the MXU, biases as (H, 1) f32 columns,
      w3 as a (1, H) bf16 row, b3 as a (1,) f32 SMEM scalar.
    """
    hidden = w1.shape[1]
    return dict(
        w1=jnp.asarray(w1, jnp.float32).T.astype(jnp.bfloat16),            # (H, F_in)
        b1=jnp.asarray(b1, jnp.float32).reshape(hidden, 1),                # (H, 1)
        w2=jnp.asarray(w2, jnp.float32).T.astype(jnp.bfloat16),            # (H, H)
        b2=jnp.asarray(b2, jnp.float32).reshape(hidden, 1),                # (H, 1)
        w3=jnp.asarray(w3, jnp.float32).reshape(1, hidden).astype(jnp.bfloat16),  # (1, H)
        b3=jnp.asarray(b3, jnp.float32).reshape(1),                        # (1,)
    )


@functools.partial(jax.jit, static_argnames=("tile_b",))
def four_layer_nn(x, kparams, tile_b: int = 2048):
    """Pallas forward pass of FourLayerNN.  x: (B, F_in) f32 -> (B, 1) f32."""
    B, f_in = x.shape
    hidden = kparams["w1"].shape[0]

    # ---- batch tiling (batch is the lane axis of every tensor in the kernel) ----
    b_aligned = _round_up(B, _LANE_ALIGN)
    tb = _round_up(max(_LANE_ALIGN, min(tile_b, b_aligned)), _LANE_ALIGN)
    if b_aligned >= 2 * _LANE_ALIGN:
        # Guarantee >= 2 grid steps so both v7x TensorCores get work (and pipelining kicks in).
        tb = min(tb, max(_LANE_ALIGN, (b_aligned // 2) // _LANE_ALIGN * _LANE_ALIGN))
    b_pad = _round_up(B, tb)
    num_tiles = b_pad // tb

    # Transpose + bf16 cast of x fuse here under jit (no standalone HBM round-trip);
    # the kernel then streams lane-dense (F_in, TILE_B) bf16 tiles.  Zero padding is
    # sliced off after the kernel (tanh/softplus of 0 is finite, so harmless).
    xt = jnp.pad(x.T.astype(jnp.bfloat16), ((0, 0), (0, b_pad - B)))

    act_dtype = jnp.bfloat16 if _use_bf16_activations() else jnp.float32
    const = lambda i: (0, 0)  # weights/biases: DMA once, stay VMEM-resident

    cost = pl.CostEstimate(
        flops=2 * b_pad * (f_in * hidden + hidden * hidden + hidden),
        transcendentals=b_pad * (2 * hidden + 2),
        bytes_accessed=b_pad * (f_in * 2 + 4)                       # bf16 x in, f32 out
        + (f_in * hidden + hidden * hidden + hidden) * 2            # bf16 weights
        + (2 * hidden + 1) * 4,                                     # f32 biases
    )

    out_rows = pl.pallas_call(
        _make_kernel(act_dtype),
        out_shape=jax.ShapeDtypeStruct((1, b_pad), jnp.float32),
        grid=(num_tiles,),
        in_specs=[
            pl.BlockSpec((f_in, tb), lambda i: (0, i)),     # x^T tile (pipelined, bf16)
            pl.BlockSpec((hidden, f_in), const),            # W1 (out,in) bf16
            pl.BlockSpec((hidden, 1), const),               # b1 column f32
            pl.BlockSpec((hidden, hidden), const),          # W2 (out,in) bf16
            pl.BlockSpec((hidden, 1), const),               # b2 column f32
            pl.BlockSpec((1, hidden), const),               # w3 row bf16
            pl.BlockSpec(memory_space=pltpu.SMEM),          # b3 scalar
        ],
        out_specs=pl.BlockSpec((1, tb), lambda i: (0, i)),  # lane-dense output row
        compiler_params=pltpu.CompilerParams(
            dimension_semantics=("parallel",),              # megacore split on v7x
            vmem_limit_bytes=32 * 1024 * 1024,              # explicit budget (v7x has 64 MiB phys)
        ),
        cost_estimate=cost,
    )(
        xt,
        kparams["w1"], kparams["b1"],
        kparams["w2"], kparams["b2"],
        kparams["w3"], kparams["b3"],
    )

    # Un-pad / reshape back to the PyTorch output shape (B, 1).
    return out_rows[0, :B].reshape(B, 1)


def init_params(key, input_size, hidden_size):
    # Deterministic init mimicking torch.nn.Linear default (uniform +/- 1/sqrt(fan_in)),
    # in "math" layout: w (in, out), b (1, out).
    ks = jax.random.split(key, 6)

    def lin(kw, kb, fan_in, fan_out):
        bound = 1.0 / jnp.sqrt(fan_in)
        w = jax.random.uniform(kw, (fan_in, fan_out), jnp.float32, -bound, bound)
        b = jax.random.uniform(kb, (1, fan_out), jnp.float32, -bound, bound)
        return w, b

    w1, b1 = lin(ks[0], ks[1], input_size, hidden_size)
    w2, b2 = lin(ks[2], ks[3], hidden_size, hidden_size)
    w3, b3 = lin(ks[4], ks[5], hidden_size, 1)
    return w1, b1, w2, b2, w3, b3


if __name__ == "__main__":
    input_size = 16
    hidden_size = 32
    batch = 500  # not tile-aligned -> also exercises the lane-padding path

    key = jax.random.PRNGKey(0)
    kx, kp = jax.random.split(key)
    x = jax.random.normal(kx, (batch, input_size), jnp.float32)
    params = init_params(kp, input_size, hidden_size)

    kparams = prepare_params(*params)   # one-time layout/bf16 prep, outside the hot path
    out = four_layer_nn(x, kparams)     # tile_b clamps to 256 here -> 2-step batch grid
    out = jax.block_until_ready(out)

    # Plain-JAX f32 reference of the PyTorch module.
    w1, b1, w2, b2, w3, b3 = params
    h1 = jnp.tanh(x @ w1 + b1)
    h2 = jnp.tanh(h1 @ w2 + b2)
    z = h2 @ w3 + b3
    ref = jnp.maximum(z, 0.0) + jnp.log1p(jnp.exp(-jnp.abs(z)))

    assert out.shape == (batch, 1)
    # bf16 MXU operands (+ bf16 tanh on v6e/v7x) vs f32 reference -> modest tolerance.
    max_err = float(jnp.max(jnp.abs(out - ref)))
    assert max_err < 5e-2, f"max abs err {max_err}"
    print("KERNEL_OK")
</pallas_src>

<mosaic_0001>
module attributes {stable_mosaic.version = 11 : i64} {
  func.func @kernel(%arg0: i32, %arg1: memref<16x256xbf16, #tpu.memory_space<vmem>>, %arg2: memref<32x16xbf16, #tpu.memory_space<vmem>>, %arg3: memref<32x1xf32, #tpu.memory_space<vmem>>, %arg4: memref<32x32xbf16, #tpu.memory_space<vmem>>, %arg5: memref<32x1xf32, #tpu.memory_space<vmem>>, %arg6: memref<1x32xbf16, #tpu.memory_space<vmem>>, %arg7: memref<1xf32, #tpu.memory_space<smem>>, %arg8: memref<1x256xf32, #tpu.memory_space<vmem>>) attributes {dimension_semantics = [#tpu.dimension_semantics<parallel>], iteration_bounds = array<i64: 2>, scalar_prefetch = 0 : i64, scratch_operands = 0 : i64, tpu.core_type = #tpu.core_type<tc>, window_params = [{transform_indices = @transform_0, window_bounds = array<i64: 16, 256>}, {pipeline_mode = #tpu.pipeline_mode<synchronous>, transform_indices = @transform_1, window_bounds = array<i64: 32, 16>}, {pipeline_mode = #tpu.pipeline_mode<synchronous>, transform_indices = @transform_2, window_bounds = array<i64: 32, 1>}, {pipeline_mode = #tpu.pipeline_mode<synchronous>, transform_indices = @transform_3, window_bounds = array<i64: 32, 32>}, {pipeline_mode = #tpu.pipeline_mode<synchronous>, transform_indices = @transform_4, window_bounds = array<i64: 32, 1>}, {pipeline_mode = #tpu.pipeline_mode<synchronous>, transform_indices = @transform_5, window_bounds = array<i64: 1, 32>}, {transform_indices = @transform_6, window_bounds = array<i64: 1>}, {transform_indices = @transform_7, window_bounds = array<i64: 1, 256>}]} {
    %c0 = arith.constant 0 : index
    %c0_0 = arith.constant 0 : index
    %0 = vector.load %arg1[%c0, %c0_0] : memref<16x256xbf16, #tpu.memory_space<vmem>>, vector<16x256xbf16>
    %c0_1 = arith.constant 0 : index
    %c0_2 = arith.constant 0 : index
    %1 = vector.load %arg2[%c0_1, %c0_2] : memref<32x16xbf16, #tpu.memory_space<vmem>>, vector<32x16xbf16>
    %cst = arith.constant dense<0.000000e+00> : vector<32x256xf32>
    %2 = tpu.matmul %1, %0, %cst {dimension_numbers = #tpu.dot_dimension_numbers<[1], [0], [0], [1], [0, 0, 1, 1], [], []>} : vector<32x16xbf16>, vector<16x256xbf16>, vector<32x256xf32> -> vector<32x256xf32>
    %c0_3 = arith.constant 0 : index
    %c0_4 = arith.constant 0 : index
    %3 = vector.load %arg3[%c0_3, %c0_4] : memref<32x1xf32, #tpu.memory_space<vmem>>, vector<32x1xf32>
    %4 = vector.broadcast %3 : vector<32x1xf32> to vector<32x256xf32>
    %5 = arith.addf %2, %4 : vector<32x256xf32>
    %6 = arith.truncf %5 : vector<32x256xf32> to vector<32x256xbf16>
    %7 = math.tanh %6 : vector<32x256xbf16>
    %c0_5 = arith.constant 0 : index
    %c0_6 = arith.constant 0 : index
    %8 = vector.load %arg4[%c0_5, %c0_6] : memref<32x32xbf16, #tpu.memory_space<vmem>>, vector<32x32xbf16>
    %cst_7 = arith.constant dense<0.000000e+00> : vector<32x256xf32>
    %9 = tpu.matmul %8, %7, %cst_7 {dimension_numbers = #tpu.dot_dimension_numbers<[1], [0], [0], [1], [0, 0, 1, 1], [], []>} : vector<32x32xbf16>, vector<32x256xbf16>, vector<32x256xf32> -> vector<32x256xf32>
    %c0_8 = arith.constant 0 : index
    %c0_9 = arith.constant 0 : index
    %10 = vector.load %arg5[%c0_8, %c0_9] : memref<32x1xf32, #tpu.memory_space<vmem>>, vector<32x1xf32>
    %11 = vector.broadcast %10 : vector<32x1xf32> to vector<32x256xf32>
    %12 = arith.addf %9, %11 : vector<32x256xf32>
    %13 = arith.truncf %12 : vector<32x256xf32> to vector<32x256xbf16>
    %14 = math.tanh %13 : vector<32x256xbf16>
    %c0_10 = arith.constant 0 : index
    %c0_11 = arith.constant 0 : index
    %15 = vector.load %arg6[%c0_10, %c0_11] : memref<1x32xbf16, #tpu.memory_space<vmem>>, vector<1x32xbf16>
    %cst_12 = arith.constant dense<0.000000e+00> : vector<1x256xf32>
    %16 = tpu.matmul %15, %14, %cst_12 {dimension_numbers = #tpu.dot_dimension_numbers<[1], [0], [0], [1], [0, 0, 1, 1], [], []>} : vector<1x32xbf16>, vector<32x256xbf16>, vector<1x256xf32> -> vector<1x256xf32>
    %c0_13 = arith.constant 0 : index
    %17 = memref.load %arg7[%c0_13] : memref<1xf32, #tpu.memory_space<smem>>
    %18 = vector.broadcast %17 : f32 to vector<1x256xf32>
    %19 = arith.addf %16, %18 : vector<1x256xf32>
    %cst_14 = arith.constant 0.000000e+00 : f32
    %20 = vector.broadcast %cst_14 : f32 to vector<1x256xf32>
    %21 = arith.maximumf %19, %20 : vector<1x256xf32>
    %22 = math.absf %19 : vector<1x256xf32>
    %cst_15 = arith.constant 0.000000e+00 : f32
    %23 = vector.broadcast %cst_15 : f32 to vector<1x256xf32>
    %24 = arith.subf %23, %22 : vector<1x256xf32>
    %25 = math.exp %24 : vector<1x256xf32>
    %26 = math.log1p %25 : vector<1x256xf32>
    %27 = arith.addf %21, %26 : vector<1x256xf32>
    %c0_16 = arith.constant 0 : index
    %c0_17 = arith.constant 0 : index
    %28 = vector.load %arg8[%c0_16, %c0_17] : memref<1x256xf32, #tpu.memory_space<vmem>>, vector<1x256xf32>
    tpu.vector_store %arg8[%c0_16, %c0_17], %27 {strides = array<i32>} : memref<1x256xf32, #tpu.memory_space<vmem>>, vector<1x256xf32>,
    return
  }
  func.func @transform_0(%arg0: i32) -> (i32, i32) {
    %c0_i32 = arith.constant 0 : i32
    %c0_i32_0 = arith.constant 0 : i32
    return %c0_i32, %arg0 : i32, i32
  }
  func.func @transform_1(%arg0: i32) -> (i32, i32) {
    %c0_i32 = arith.constant 0 : i32
    %c0_i32_0 = arith.constant 0 : i32
    %c0_i32_1 = arith.constant 0 : i32
    return %c0_i32, %c0_i32_0 : i32, i32
  }
  func.func @transform_2(%arg0: i32) -> (i32, i32) {
    %c0_i32 = arith.constant 0 : i32
    %c0_i32_0 = arith.constant 0 : i32
    %c0_i32_1 = arith.constant 0 : i32
    return %c0_i32, %c0_i32_0 : i32, i32
  }
  func.func @transform_3(%arg0: i32) -> (i32, i32) {
    %c0_i32 = arith.constant 0 : i32
    %c0_i32_0 = arith.constant 0 : i32
    %c0_i32_1 = arith.constant 0 : i32
    return %c0_i32, %c0_i32_0 : i32, i32
  }
  func.func @transform_4(%arg0: i32) -> (i32, i32) {
    %c0_i32 = arith.constant 0 : i32
    %c0_i32_0 = arith.constant 0 : i32
    %c0_i32_1 = arith.constant 0 : i32
    return %c0_i32, %c0_i32_0 : i32, i32
  }
  func.func @transform_5(%arg0: i32) -> (i32, i32) {
    %c0_i32 = arith.constant 0 : i32
    %c0_i32_0 = arith.constant 0 : i32
    %c0_i32_1 = arith.constant 0 : i32
    return %c0_i32, %c0_i32_0 : i32, i32
  }
  func.func @transform_6(%arg0: i32) -> i32 {
    %c0_i32 = arith.constant 0 : i32
    %c0_i32_0 = arith.constant 0 : i32
    return %c0_i32 : i32
  }
  func.func @transform_7(%arg0: i32) -> (i32, i32) {
    %c0_i32 = arith.constant 0 : i32
    %c0_i32_0 = arith.constant 0 : i32
    return %c0_i32, %arg0 : i32, i32
  }
}

</mosaic_0001>

<bundles_post_ra>
// kernel: four_layer_nn.1
= control target key start
LH: loop header
LB: loop body
LE: loop exit
PB: predicated region body
PF: predicated region fallthrough
CT: control target
= control target key end

     0   :  { %s953_s0 = inlined_call_operand.vmem [shape: bf16[16,512], index: 0, kind: input, shape index: {}]   ;;  %s954_s1 = inlined_call_operand.vmem [shape: bf16[32,16], index: 1, kind: input, shape index: {}]   ;;  %s955_s2 = inlined_call_operand.vmem [shape: f32[32,1], index: 2, kind: input, shape index: {}]   ;;  %s956_s3 = inlined_call_operand.vmem [shape: bf16[32,32], index: 3, kind: input, shape index: {}]   ;;  %s957_s4 = inlined_call_operand.vmem [shape: f32[32,1], index: 4, kind: input, shape index: {}]   ;;  %s958_s5 = inlined_call_operand.vmem [shape: bf16[1,32], index: 5, kind: input, shape index: {}]   ;;  %s959_s6 = inlined_call_operand.<no memory space> [shape: f32[1], index: 6, kind: input, shape index: {}]   ;;  %s960_s7 = inlined_call_operand.vmem [shape: f32[1,512], index: 7, kind: output, shape index: {}]  }
   0x1   :  { %12 = sst [smem:[#allocation2]] %s959_s6 }
   0x2   :  { %s852_s26 = smov 0   ;;  %s854_s27 = smov 0  }
   0x3   :  { %s856_s28 = smov 0  }
   0x4 LB: > { %s700_s6 = sadd.s32 4294967295, %s805_s28   ;;  %s869_s29 = sadd.s32 1, %s805_s28   ;;  %s805_s28 = sphi %s856_s28, %s963_s28   ;;  %s801_s27 = sphi %s854_s27, %s962_s27   ;;  %s797_s26 = sphi %s852_s26, %s961_s26  }
   0x5   : > { %s22_s30 = ssub.s32 %s805_s28, %s869_s29  ;;  %s25_s8 = sadd.s32 1, %s801_s27 }
   0x6   : > { %p23_p0 = scmp.eq.s32.totalorder %s22_s30, 0  ;;  %p32_p1 = scmp.ne.s32.totalorder %s801_s27, %s797_s26 }
   0x7   : > { %p33_p2 = scmp.eq.s32.totalorder %s805_s28, 0  ;;  %p703_p4 = scmp.ge.s32.totalorder %s805_s28, 2 }
   0x8   : > { %s878_s9 = scalar_select %p23_p0, %s801_s27, %s25_s8  }
   0x9   : > { %p34_p3 = por %p33_p2, %p32_p1  ;;  %228 = sbr.rel (%p703_p4) target bundleno = 23 (0x17), region = 40 }
  0x10   : > { %231 = sbr.rel (!%p34_p3) target bundleno = 23 (0x17), region = 44  ;;  %s233_s10 = sand.u32 (%p34_p3), 1, %s801_s27  }
  0x11   : > { %s723_s11 = sshll.u32 (%p34_p3), %s805_s28, 3  ;;  %s704_s12 = sshll.u32 (%p34_p3), %s233_s10, 4 }
  0x12   : > { %s238_s15 = scalar_lea.vmem (%p34_p3), %s953_s0, %s723_s11  ;;  %s235_s16 = scalar_lea.vmem (%p34_p3), [#allocation3], %s704_s12 }
  0x13   : > { %v268_v0 = vld [vmem:[%s238_s15] sm:$0xff] (%p34_p3)  ;;  %v270_v1 = vld [vmem:[%s238_s15 + $0x10] sm:$0xff] (%p34_p3) }
  0x14   : > { %269 = vst [vmem:[%s235_s16] sm:$0xff] (%p34_p3), %v268_v0  ;;  %271 = vst [vmem:[%s235_s16 + $0x8] sm:$0xff] (%p34_p3), %v270_v1 }
  0x17 PF: > { %p707_p5 = scmp.ge.s32.totalorder %s805_s28, 1  ;;  %p276_p6 = scmp.lt.s32.totalorder %s805_s28, 3 }
  0x19   : > { %p277_p7 = pnand %p707_p5, %p276_p6 }
  0x1a   : > { %s283_s17 = sand.u32 (!%p277_p7), 1, %s797_s26   ;;  %v807_v2 = vmov (!%p277_p7), 0   ;;  %v326_v3 = vld [vmem:[%s955_s2] sm:$0xff] (!%p277_p7)  ;;  %v328_v4 = vld [vmem:[%s955_s2 + $0x10] sm:$0xff] (!%p277_p7)  ;;  %v327_v7 = vld [vmem:[%s955_s2 + $0x8] sm:$0xff] (!%p277_p7)  ;;  %vm370_vm0 = vcmask (!%p277_p7), 130048  }
  0x1b   : > { %280 = sbr.rel (%p277_p7) target bundleno = 777 (0x309), region = 82  ;;  %s708_s18 = sshll.u32 (!%p277_p7), %s283_s17, 4  ;;  %409 = vmatprep.mubr.bf16.mxu0 (!%p277_p7), %v807_v2  ;;  %750 = vset.pattern.permute.xlu0 (!%p277_p7), %v807_v2  ;;  %v329_v8 = vld [vmem:[%s955_s2 + $0x18] sm:$0xff] (!%p277_p7)  ;;  %v755_v9 = vld [vmem:[%s954_s1] sm:$0xff] (!%p277_p7)   ;;  %v443_v11 = vld [vmem:[%s957_s4 + $0x8] sm:$0xff] (!%p277_p7)  ;;  %vm476_vm1 = vcmask (!%p277_p7), 261120  }
  0x1c   : > { %751 = vset.pattern.permute.xlu1 (!%p277_p7), %v807_v2  ;;  %515 = vmatprep.mubr.bf16.mxu1 (!%p277_p7), %v807_v2  ;;  %s285_s23 = scalar_lea.vmem (!%p277_p7), [#allocation3], %s708_s18  ;;  %v442_v10 = vld [vmem:[%s957_s4] sm:$0xff] (!%p277_p7)  ;;  %v444_v12 = vld [vmem:[%s957_s4 + $0x10] sm:$0xff] (!%p277_p7)  ;;  %v445_v13 = vld [vmem:[%s957_s4 + $0x18] sm:$0xff] (!%p277_p7)  ;;  %s545_s30 = sld [smem:[#allocation2]] (!%p277_p7) }
  0x1d   : > { %v752_v5 = vld [vmem:[%s285_s23 + $0x4] ss:$8 sps:$4 sm:$0xff] (!%p277_p7)   ;;  %332 = vperm.xlu0 (!%p277_p7), %750, %v326_v3   ;;  %342 = vperm.xlu1 (!%p277_p7), %751, %v328_v4   ;;  %v754_v6 = vld [vmem:[%s285_s23] ss:$8 sps:$4 sm:$0xff] (!%p277_p7)   ;;  %s709_s8 = sshll.u32 (!%p277_p7), %s700_s6, 1 }
  0x1e   : > { %377 = vmatprep.subr.bf16.mxu0 (!%p277_p7), %v752_v5  ;;  %v756_v14 = vld [vmem:[%s954_s1 + $0x8] sm:$0xff] (!%p277_p7)   ;;  %v757_v43 = vld [vmem:[%s956_s3] sm:$0xff] (!%p277_p7)   ;;  %p315_p8 = scmp.lt.s32.totalorder (!%p277_p7), %s709_s8, 3 }
  0x1f   : > { %378 = vmatpush1.bf16.msra.mxu0 (!%p277_p7), %v754_v6  ;;  %v758_v44 = vld [vmem:[%s956_s3 + $0x8] sm:$0xff] (!%p277_p7)  }
  0x21   : > { %337 = vperm.xlu0 (!%p277_p7), %750, %v327_v7   ;;  %347 = vperm.xlu1 (!%p277_p7), %751, %v329_v8  }
  0x22   : > { %714 = vmatmul.mubr.msk.bf16.vlgmr.msra.gmra.mrb[0].mxu0 %vm370_vm0, %v755_v9  ;;  %v544_v9 = vld [vmem:[%s958_s5] sm:$0x1]  ;;  %s965_s8 = smov (!%p315_p8, %s709_s8), 3 }
  0x23   : > { %419 = vmatprep.mubr.bf16.mxu0 %v807_v2  ;;  %s317_s10 = scalar_lea.vmem %s960_s7, %s965_s8 }
  0x25   : > { %448 = vperm.xlu0 %750, %v442_v10   ;;  %453 = vperm.xlu1 %751, %v443_v11   ;;  %v546_v10 = vstv %s545_s30 }
  0x29   : > { %458 = vperm.xlu0 %750, %v444_v12   ;;  %463 = vperm.xlu1 %751, %v445_v13  }
  0x2a   : > { %715 = vmatmul.mubr.msk.bf16.gmra.mrb[4].mxu0 %vm370_vm0, %v756_v14 }
  0x2b   : > { %582 = vmatprep.mubr.bf16.mxu0 %v807_v2 }
  0x9c   : > { %v333_v15 = vpop.permute.xlu0 %332  ;;  %v343_v23 = vpop.permute.xlu1 %342 }
  0xa0   : > { %v338_v18 = vpop.permute.xlu0 %337  ;;  %v348_v30 = vpop.permute.xlu1 %347 }
  0xa4   : > { %v449_v46 = vpop.permute.xlu0 %448  ;;  %v454_v48 = vpop.permute.xlu1 %453 }
  0xa8   : > { %v459_v58 = vpop.permute.xlu0 %458  ;;  %v464_v60 = vpop.permute.xlu1 %463 }
  0xf5   : > { %v411_v16 = vpop.f32.mrb[0].mxu0 }
  0xf6   : > { %v413_v17 = vpop.f32.mrb[1].mxu0  ;;  %v412_v20 = vadd.f32 %v411_v16, %v333_v15 }
  0xf7   : > { %v415_v19 = vpop.f32.mrb[2].mxu0  ;;  %v414_v24 = vadd.f32 %v413_v17, %v333_v15 }
  0xf8   : > { %v416_v21 = vadd.f32 %v415_v19, %v338_v18  ;;  %v417_v22 = vpop.f32.mrb[3].mxu0 }
  0xf9   : > { %v418_v25 = vadd.f32 %v417_v22, %v338_v18 }
  0xfa   : > { %v430_v26 = vpack.c.bf16 %v416_v21, %v412_v20 }
  0xfb   : > { %v431_v27 = vpack.c.bf16 %v418_v25, %v414_v24 }
  0xfd   : > { %v421_v28 = vpop.f32.mrb[4].mxu0  ;;  %759 = vtanh.bf16 %v431_v27 }
  0xfe   : > { %761 = vtanh.bf16 %v430_v26  ;;  %v423_v29 = vpop.f32.mrb[5].mxu0  ;;  %v422_v32 = vadd.f32 %v421_v28, %v343_v23 }
  0xff   : > { %v425_v31 = vpop.f32.mrb[6].mxu0  ;;  %v424_v35 = vadd.f32 %v423_v29, %v343_v23 }
 0x100   : > { %v426_v33 = vadd.f32 %v425_v31, %v348_v30  ;;  %v427_v34 = vpop.f32.mrb[7].mxu0 }
 0x101   : > { %v428_v36 = vadd.f32 %v427_v34, %v348_v30  ;;  %v808_v30 = vmov 1966171168  }
 0x102   : > { %v432_v37 = vpack.c.bf16 %v426_v33, %v422_v32  ;;  %v625_v31 = vunpack.c.l.s4 %v808_v30  ;;  %v627_v32 = vlaneseq }
 0x103   : > { %v433_v38 = vpack.c.bf16 %v428_v36, %v424_v35 }
 0x104   : > { %vm641_vm4 = vcmp.lt.s32.totalorder %v627_v32, 256 }
 0x105   : > { %763 = vtanh.bf16 %v433_v38 }
 0x106   : > { %765 = vtanh.bf16 %v432_v37 }
 0x108   : > { %v760_v39 = vpop.eup %759 }
 0x109   : > { %v762_v40 = vpop.eup %761  ;;  %483 = vmatprep.subr.bf16.mxu1 %v760_v39 }
 0x10a   : > { %484 = vmatpush1.bf16.msra.mxu1 %v762_v40  ;;  %v626_v40 = vunpack.c.0.s8 %v625_v31 }
 0x110   : > { %v764_v41 = vpop.eup %763 }
 0x111   : > { %v766_v42 = vpop.eup %765  ;;  %485 = vmatprep.subr.bf16.mxu1 %v764_v41  ;;  %v628_v41 = vshrl.u32 %v627_v32, 7 }
 0x112   : > { %486 = vmatpush1.bf16.msra.mxu1 %v766_v42 }
 0x115   : > { %718 = vmatmul.mubr.msk.bf16.vlgmr.msra.gmra.mrb[0].mxu1 %vm476_vm1, %v757_v43 }
 0x116   : > { %525 = vmatprep.mubr.bf16.mxu1 %v807_v2 }
 0x11d   : > { %719 = vmatmul.mubr.msk.bf16.gmra.mrb[4].mxu1 %vm476_vm1, %v758_v44 }
 0x1e8   : > { %v517_v45 = vpop.f32.mrb[0].mxu1 }
 0x1e9   : > { %v519_v47 = vpop.f32.mrb[1].mxu1  ;;  %v518_v50 = vadd.f32 %v517_v45, %v449_v46 }
 0x1ea   : > { %v521_v49 = vpop.f32.mrb[2].mxu1  ;;  %v520_v53 = vadd.f32 %v519_v47, %v449_v46 }
 0x1eb   : > { %v522_v51 = vadd.f32 %v521_v49, %v454_v48  ;;  %v523_v52 = vpop.f32.mrb[3].mxu1 }
 0x1ec   : > { %v524_v54 = vadd.f32 %v523_v52, %v454_v48 }
 0x1ed   : > { %v536_v55 = vpack.c.bf16 %v522_v51, %v518_v50  ;;  %v629_v50 = vsub.s32 %v626_v40, %v628_v41 }
 0x1ee   : > { %v537_v56 = vpack.c.bf16 %v524_v54, %v520_v53 }
 0x1f0   : > { %767 = vtanh.bf16 %v537_v56  ;;  %v527_v57 = vpop.f32.mrb[4].mxu1 }
 0x1f1   : > { %769 = vtanh.bf16 %v536_v55  ;;  %v529_v59 = vpop.f32.mrb[5].mxu1  ;;  %v528_v62 = vadd.f32 %v527_v57, %v459_v58 }
 0x1f2   : > { %v531_v61 = vpop.f32.mrb[6].mxu1  ;;  %v530_v1 = vadd.f32 %v529_v59, %v459_v58 }
 0x1f3   : > { %v532_v63 = vadd.f32 %v531_v61, %v464_v60  ;;  %v533_v0 = vpop.f32.mrb[7].mxu1 }
 0x1f4   : > { %v534_v2 = vadd.f32 %v533_v0, %v464_v60 }
 0x1f5   : > { %v538_v3 = vpack.c.bf16 %v532_v63, %v528_v62 }
 0x1f6   : > { %v539_v4 = vpack.c.bf16 %v534_v2, %v530_v1 }
 0x1f8   : > { %771 = vtanh.bf16 %v539_v4 }
 0x1f9   : > { %773 = vtanh.bf16 %v538_v3 }
 0x1fb   : > { %v768_v5 = vpop.eup %767 }
 0x1fc   : > { %v770_v6 = vpop.eup %769  ;;  %550 = vmatprep.subr.bf16.mxu0 %v768_v5 }
 0x1fd   : > { %551 = vmatpush1.bf16.msra.mxu0 %v770_v6 }
 0x203   : > { %v772_v7 = vpop.eup %771 }
 0x204   : > { %v774_v8 = vpop.eup %773  ;;  %552 = vmatprep.subr.bf16.mxu0 %v772_v7 }
 0x205   : > { %553 = vmatpush1.bf16.msra.mxu0 %v774_v8 }
 0x208   : > { %720 = vmatmul.mubr.msk.bf16.vlgmr.msra.gmra.mrb[8].mxu0 %vm476_vm1, %v544_v9 }
 0x2db   : > { %v584_v11 = vpop.f32.mrb[8].mxu0 }
 0x2dc   : > { %v585_v12 = vadd.f32 %v584_v11, %v546_v10  ;;  %v586_v13 = vpop.f32.mrb[9].mxu0 }
 0x2dd   : > { %v587_v14 = vadd.f32 %v586_v13, %v546_v10  ;;  %v588_v15 = vpop.f32.mrb[10].mxu0 }
 0x2de   : > { %v593_v16 = vand.u32 2147483647, %v585_v12  ;;  %v589_v17 = vpop.f32.mrb[11].mxu0  ;;  %v591_v42 = vmax.f32 %v585_v12, 0.0 }
 0x2df   : > { %v594_v18 = vand.u32 2147483647, %v587_v14  ;;  %v592_v46 = vmax.f32 %v587_v14, 0.0 }
 0x2e0   : > { %v595_v19 = vsub.f32 0.0, %v593_v16 }
 0x2e1   : > { %v596_v20 = vsub.f32 0.0, %v594_v18 }
 0x2e2   : > { %v597_v21 = vmul.f32 1.442695, %v595_v19 }
 0x2e3   : > { %v599_v22 = vmul.f32 1.442695, %v596_v20 }
 0x2e4   : > { %775 = vpow2.f32 %v597_v21 }
 0x2e5   : > { %777 = vpow2.f32 %v599_v22 }
 0x2ee   : > { %v776_v23 = vpop.eup %775 }
 0x2ef   : > { %v778_v24 = vpop.eup %777  ;;  %v601_v25 = vadd.f32 1.0, %v776_v23  ;;  %v604_v27 = vmul.f32 -0.5, %v776_v23  ;;  %v607_v33 = vand.u32 2147483647, %v776_v23 }
 0x2f0   : > { %v610_v26 = vadd.f32 1.0, %v778_v24  ;;  %v613_v28 = vmul.f32 -0.5, %v778_v24  ;;  %v616_v35 = vand.u32 2147483647, %v778_v24 }
 0x2f1   : > { %779 = vlog2.f32 %v601_v25  ;;  %v605_v29 = vadd.f32 1.0, %v604_v27  ;;  %vm608_vm2 = vcmp.lt.f32.partialorder %v607_v33, 0.0004427343 }
 0x2f2   : > { %781 = vlog2.f32 %v610_v26  ;;  %v614_v34 = vadd.f32 1.0, %v613_v28  ;;  %vm617_vm3 = vcmp.lt.f32.partialorder %v616_v35, 0.0004427343 }
 0x2f3   : > { %v606_v39 = vmul.f32 %v776_v23, %v605_v29 }
 0x2f4   : > { %v615_v44 = vmul.f32 %v778_v24, %v614_v34 }
 0x2fb   : > { %v780_v36 = vpop.eup %779 }
 0x2fc   : > { %v782_v37 = vpop.eup %781  ;;  %v603_v38 = vmul.f32 0.6931472, %v780_v36 }
 0x2fd   : > { %v612_v43 = vmul.f32 0.6931472, %v782_v37 }
 0x2fe   : > { %v609_v45 = vsel %vm608_vm2, %v606_v39, %v603_v38 }
 0x2ff   : > { %v619_v47 = vadd.f32 %v609_v45, %v591_v42  ;;  %v618_v48 = vsel %vm617_vm3, %v615_v44, %v612_v43 }
 0x300   : > { %v620_v49 = vadd.f32 %v618_v48, %v592_v46 }
 0x302   : > { %v623_v51 = vcombine.low %v619_v47, %v620_v49 }
 0x304   : > { %v630_v52 = vrot.slane %v623_v51, %v629_v50 }
 0x306   : > { %v637_v53 = vrot.slane %v630_v52, %v629_v50 }
 0x308   : > { %643 = vst.msk [vmem:[%s317_s10] sm:$0x3] %vm641_vm4, %v637_v53 }
 0x309 PF: > { %p15_p9 = scmp.ge.s32.totalorder %s869_s29, 4   ;;  %s961_s26 = smov %s801_s27 }
 0x30a   : > { %s962_s27 = smov %s878_s9  ;;  %s963_s28 = smov %s869_s29 }
 0x30b   :  { %17 = sbr.rel (!%p15_p9) target bundleno = 4 (0x4), region = 121 }

</bundles_post_ra>
